<compile_context>
chip_gen: v5e
topology: v5e:2x2
jax: 0.10.0
libtpu: 0.0.40
codegen_flags: <defaults>
</compile_context>

<pallas_src>
import jax
import jax.numpy as jnp
from jax import lax
from jax.experimental import pallas as pl
from jax.experimental.pallas import tpu as pltpu


def _tln_kernel(params_ref, x_ref, o_ref):
    # params_ref: SMEM, shape (2,) float32 -> [m_param, s_param]
    # x_ref/o_ref: VMEM blocks of shape (tile_b, C, tile_hw); channels on
    # sublanes, pixels lane-dense.
    x = x_ref[...]
    m_param = params_ref[0]
    s_param = params_ref[1]
    inv_c = jnp.float32(1.0 / x.shape[1])

    if x.dtype == jnp.float32:
        mean = jnp.sum(x, axis=1, keepdims=True) * inv_c          # (tb, 1, thw)
        d = x - mean
        var = jnp.sum(d * d, axis=1, keepdims=True) * inv_c       # centered moment
        scale = s_param * lax.rsqrt(var)                          # EUP rsqrt, no eps
        o_ref[...] = (scale * (d + m_param)).astype(o_ref.dtype)
    else:
        # f32 moments, low-precision final normalize (bf16 VALU on v6e/v7x) to
        # cut live f32 vreg/VMEM pressure.
        # TODO(synk): on v5e (no bf16 VALU) prefer the pure-f32 path above.
        xf = x.astype(jnp.float32)
        mean = jnp.sum(xf, axis=1, keepdims=True) * inv_c
        d = xf - mean
        var = jnp.sum(d * d, axis=1, keepdims=True) * inv_c
        scale = (s_param * lax.rsqrt(var)).astype(x.dtype)
        mean_lo = mean.astype(x.dtype)
        m_lo = m_param.astype(x.dtype)
        o_ref[...] = ((x - mean_lo + m_lo) * scale).astype(o_ref.dtype)


def _largest_divisor_leq(n, cap):
    cap = max(1, min(n, cap))
    for d in range(cap, 0, -1):
        if n % d == 0:
            return d
    return 1


def _choose_tiles(B, C, HW, target_bytes=4 * 1024 * 1024):
    """Pick (tile_b, tile_hw).

    Sizing is based on the f32 working set (~2 live f32 copies of the block),
    independent of the input itemsize, so bf16 inputs don't understate VMEM
    pressure.  Prefers lane-dense tile_hw that exactly divides HW (unmasked
    stores, no padded tail columns)."""
    f32_cols_budget = max(128, target_bytes // (C * 4 * 2))

    if HW <= 128:
        # Small-HW regime (e.g. deep ConvNeXt stages, HW = 49): keep the full
        # extent on the lane axis and fold batches into the block to amortize
        # per-step overhead; keep >= 2 grid steps for megacore when possible.
        # TODO(synk): repack to (C, Bsub*HW) via manual DMA for full lane density.
        tile_hw = HW
        max_b = max(1, f32_cols_budget // max(1, HW))
        cap = max(1, B // 2) if B >= 2 else 1
        tile_b = _largest_divisor_leq(B, min(max_b, cap))
        return tile_b, tile_hw

    cap_cols = min(f32_cols_budget, HW)
    t = (cap_cols // 128) * 128
    while t >= 128:
        if HW % t == 0:
            return 1, t                      # exact divisor -> unmasked stores
        t -= 128
    # No 128-multiple divisor within budget: full-extent block is always legal,
    # otherwise accept a masked tail tile via cdiv.
    if HW <= f32_cols_budget:
        return 1, HW
    return 1, (cap_cols // 128) * 128


def transposed_ln(x, m_param, s_param):
    """x: (B, C, H, W) NCHW.  m_param, s_param: scalar parameters (shape (1,))."""
    B, C, H, W = x.shape
    HW = H * W
    x3d = x.reshape(B, C, HW)                     # free reshape, no HBM transpose

    tile_b, tile_hw = _choose_tiles(B, C, HW)
    n_b = B // tile_b
    n_hw = pl.cdiv(HW, tile_hw)

    params = jnp.concatenate(
        [m_param.reshape(-1), s_param.reshape(-1)]
    ).astype(jnp.float32)                         # shape (2,)

    itemsize = jnp.dtype(x.dtype).itemsize
    cost = pl.CostEstimate(
        flops=7 * B * C * HW,                     # mean/center/square/normalize
        transcendentals=B * HW,                   # one rsqrt per pixel column
        bytes_accessed=2 * B * C * HW * itemsize, # one read + one write
    )

    out3d = pl.pallas_call(
        _tln_kernel,
        out_shape=jax.ShapeDtypeStruct((B, C, HW), x.dtype),
        grid_spec=pl.GridSpec(
            grid=(n_b, n_hw),
            in_specs=[
                pl.BlockSpec(memory_space=pltpu.SMEM),                       # scalar params
                pl.BlockSpec((tile_b, C, tile_hw), lambda b, j: (b, 0, j)),  # x block
            ],
            out_specs=pl.BlockSpec((tile_b, C, tile_hw), lambda b, j: (b, 0, j)),
        ),
        compiler_params=pltpu.CompilerParams(
            dimension_semantics=("parallel", "parallel"),
            # ~4 MiB blocks * (2 in + 2 out buffers) + f32 temporaries stays far
            # below this; 48 MiB is safe under v7x's 64 MiB physical VMEM and
            # comfortable on v5e/v6e.
            vmem_limit_bytes=48 * 1024 * 1024,
        ),
        cost_estimate=cost,
    )(params, x3d)

    return out3d.reshape(B, C, H, W)


def transposed_ln_ref(x, m_param, s_param):
    """Pure-JAX reference matching torch.std_mean(dim=1, unbiased=False)."""
    mean = jnp.mean(x, axis=1, keepdims=True)
    std = jnp.sqrt(jnp.mean((x - mean) ** 2, axis=1, keepdims=True))
    return s_param.reshape(()) / std * (x - mean + m_param.reshape(()))


if __name__ == "__main__":
    key = jax.random.PRNGKey(0)
    B, C, H, W = 2, 4, 16, 16
    x = jax.random.normal(key, (B, C, H, W), dtype=jnp.float32)

    # Deterministic parameter init matching nn.Parameter(torch.zeros(1)) / torch.ones(1)
    m_param = jnp.zeros((1,), dtype=jnp.float32)
    s_param = jnp.ones((1,), dtype=jnp.float32)

    y = transposed_ln(x, m_param, s_param)
    y = jax.block_until_ready(y)

    y_ref = transposed_ln_ref(x, m_param, s_param)
    assert y.shape == (B, C, H, W)
    assert jnp.allclose(y, y_ref, atol=1e-5, rtol=1e-5), "mismatch vs reference"

    print("KERNEL_OK")
</pallas_src>

<mosaic_0001>
module attributes {stable_mosaic.version = 11 : i64} {
  func.func @_tln_kernel(%arg0: i32, %arg1: i32, %arg2: memref<2xf32, #tpu.memory_space<smem>>, %arg3: memref<1x4x256xf32, #tpu.memory_space<vmem>>, %arg4: memref<1x4x256xf32, #tpu.memory_space<vmem>>) attributes {dimension_semantics = [#tpu.dimension_semantics<parallel>, #tpu.dimension_semantics<parallel>], iteration_bounds = array<i64: 2, 1>, scalar_prefetch = 0 : i64, scratch_operands = 0 : i64, tpu.core_type = #tpu.core_type<tc>, window_params = [{transform_indices = @transform_0, window_bounds = array<i64: 2>}, {transform_indices = @transform_1, window_bounds = array<i64: 1, 4, 256>}, {transform_indices = @transform_2, window_bounds = array<i64: 1, 4, 256>}]} {
    %c0 = arith.constant 0 : index
    %c0_0 = arith.constant 0 : index
    %c0_1 = arith.constant 0 : index
    %0 = vector.load %arg3[%c0, %c0_0, %c0_1] : memref<1x4x256xf32, #tpu.memory_space<vmem>>, vector<1x4x256xf32>
    %c0_2 = arith.constant 0 : index
    %1 = memref.load %arg2[%c0_2] : memref<2xf32, #tpu.memory_space<smem>>
    %c1 = arith.constant 1 : index
    %2 = memref.load %arg2[%c1] : memref<2xf32, #tpu.memory_space<smem>>
    %cst = arith.constant dense<0.000000e+00> : vector<1x256xf32>
    %3 = vector.multi_reduction <add>, %0, %cst [1] : vector<1x4x256xf32> to vector<1x256xf32>
    %4 = vector.shape_cast %3 : vector<1x256xf32> to vector<1x1x256xf32>
    %cst_3 = arith.constant 2.500000e-01 : f32
    %5 = vector.broadcast %cst_3 : f32 to vector<1x1x256xf32>
    %6 = arith.mulf %4, %5 : vector<1x1x256xf32>
    %7 = vector.broadcast %6 : vector<1x1x256xf32> to vector<1x4x256xf32>
    %8 = arith.subf %0, %7 : vector<1x4x256xf32>
    %9 = arith.mulf %8, %8 : vector<1x4x256xf32>
    %cst_4 = arith.constant dense<0.000000e+00> : vector<1x256xf32>
    %10 = vector.multi_reduction <add>, %9, %cst_4 [1] : vector<1x4x256xf32> to vector<1x256xf32>
    %11 = vector.shape_cast %10 : vector<1x256xf32> to vector<1x1x256xf32>
    %cst_5 = arith.constant 2.500000e-01 : f32
    %12 = vector.broadcast %cst_5 : f32 to vector<1x1x256xf32>
    %13 = arith.mulf %11, %12 : vector<1x1x256xf32>
    %14 = math.rsqrt %13 : vector<1x1x256xf32>
    %15 = vector.broadcast %2 : f32 to vector<1x1x256xf32>
    %16 = arith.mulf %15, %14 : vector<1x1x256xf32>
    %17 = vector.broadcast %1 : f32 to vector<1x4x256xf32>
    %18 = arith.addf %8, %17 : vector<1x4x256xf32>
    %19 = vector.broadcast %16 : vector<1x1x256xf32> to vector<1x4x256xf32>
    %20 = arith.mulf %19, %18 : vector<1x4x256xf32>
    %c0_6 = arith.constant 0 : index
    %c0_7 = arith.constant 0 : index
    %c0_8 = arith.constant 0 : index
    %21 = vector.load %arg4[%c0_6, %c0_7, %c0_8] : memref<1x4x256xf32, #tpu.memory_space<vmem>>, vector<1x4x256xf32>
    tpu.vector_store %arg4[%c0_6, %c0_7, %c0_8], %20 {strides = array<i32>} : memref<1x4x256xf32, #tpu.memory_space<vmem>>, vector<1x4x256xf32>,
    return
  }
  func.func @transform_0(%arg0: i32, %arg1: i32) -> i32 {
    %c0_i32 = arith.constant 0 : i32
    %c0_i32_0 = arith.constant 0 : i32
    return %c0_i32 : i32
  }
  func.func @transform_1(%arg0: i32, %arg1: i32) -> (i32, i32, i32) {
    %c0_i32 = arith.constant 0 : i32
    %c0_i32_0 = arith.constant 0 : i32
    return %arg0, %c0_i32, %arg1 : i32, i32, i32
  }
  func.func @transform_2(%arg0: i32, %arg1: i32) -> (i32, i32, i32) {
    %c0_i32 = arith.constant 0 : i32
    %c0_i32_0 = arith.constant 0 : i32
    return %arg0, %c0_i32, %arg1 : i32, i32, i32
  }
}

</mosaic_0001>

<bundles_post_ra>
// kernel: tpu_custom_call.1
= control target key start
LH: loop header
LB: loop body
LE: loop exit
PB: predicated region body
PF: predicated region fallthrough
CT: control target
= control target key end

     0   :  { %7 = vsyncpa [#allocation5], 0  ;;  %s806_s0 = inlined_call_operand.hbm [shape: f32[2], index: 0, kind: input, shape index: {}]   ;;  %s807_s1 = inlined_call_operand.hbm [shape: f32[2,4,256], index: 1, kind: input, shape index: {}]   ;;  %s808_s2 = inlined_call_operand.hbm [shape: f32[2,4,256], index: 2, kind: output, shape index: {}]  }
   0x1   :  { %8 = vsyncpa [#allocation3], 0 }
   0x2   :  { %10 = vsyncpa [#allocation3 + $0x1], 0 }
   0x3   :  { %11 = vsyncpa [#allocation4], 0 }
   0x4   :  { %13 = vsyncpa [#allocation4 + $0x1], 0  ;;  %s651_s9 = smov 0   ;;  %s653_s10 = smov 0  }
   0x5   :  { %s655_s11 = smov 0   ;;  %s657_s12 = smov 0  }
   0x6   :  { %s659_s13 = smov 0   ;;  %s661_s14 = smov 0  }
   0x7 LB: > { %s405_s15 = sadd.s32 4294967295, %s633_s14   ;;  %s406_s16 = sadd.s32 4294967294, %s633_s14   ;;  %s633_s14 = sphi %s661_s14, %s19_s14   ;;  %s629_s13 = sphi %s659_s13, %s820_s13   ;;  %s625_s12 = sphi %s657_s12, %s819_s12   ;;  %s621_s11 = sphi %s655_s11, %s818_s11   ;;  %s617_s10 = sphi %s653_s10, %s817_s10   ;;  %s613_s9 = sphi %s651_s9, %s816_s9  }
   0x8   : > { %p74_p0 = scmp.ne.s32.totalorder %s617_s10, %s613_s9  ;;  %p685_p1 = scmp.eq.s32.totalorder %s405_s15, 0 }
   0x9   : > { %p689_p2 = scmp.eq.s32.totalorder %s405_s15, 1  ;;  %p106_p3 = scmp.eq.s32.totalorder %s406_s16, 1 }
   0xa   : > { %p695_p4 = por %p685_p1, %p74_p0  ;;  %p407_p5 = scmp.ge.s32.totalorder %s633_s14, 1 }
   0xb   : > { %p700_p6 = por %p106_p3, %p74_p0  ;;  %p113_p7 = scmp.lt.s32.totalorder %s633_s14, 3 }
   0xc   : > { %s125_s23 = sshll.u32 %s806_s0, 4  ;;  %s31_s25 = sadd.s32 1, %s629_s13  ;;  %s126_s23 = int_to_ptr.hbm [resolvable:$true] %s125_s23 }
   0xd   : > { %p708_p8 = pnand %p407_p5, %p113_p7  ;;  %s61_s26 = sadd.s32 1, %s621_s11 }
   0xe   : > { %p33_p12 = scmp.ge.s32.totalorder %s31_s25, 2  ;;  %s635_s27 = smov [#allocation2]  }
   0xf   : > { %p433_p10 = pneg %p708_p8  ;;  %p68_p13 = scmp.ne.s32.totalorder %s621_s11, %s617_s10 }
  0x10   : > { %s822_s25 = smov (%p33_p12, %s31_s25), 0  ;;  %p69_p0 = scmp.eq.s32.totalorder %s633_s14, 0 }
  0x11   : > { %p434_p11 = pnand %p433_p10, %p685_p1  ;;  %s56_s28 = ssub.s32 %s629_s13, %s822_s25 }
  0x12   : > { %p446_p3 = scmp.lt.s32.totalorder %s633_s14, 2  ;;  %p59_p5 = scmp.eq.s32.totalorder %s56_s28, 0 }
  0x13   : > { %436 = dma.hbm_to_smem (!%p434_p11), %s126_s23, 16, %s635_s27, [#allocation5]  }
  0x14   : > { %p70_p7 = por %p69_p0, %p68_p13  ;;  %p729_p9 = por %p689_p2, %p68_p13 }
  0x15   : > { %s136_s30 = sand.u32 1, %s621_s11   ;;  %s423_s5 = sshll.u32 %s629_s13, 3 }
  0x16   : > { %s735_s3 = scalar_select %p59_p5, %s621_s11, %s61_s26  }
  0x17   : > { %s410_s4 = sshll.u32 %s136_s30, 3  ;;  %s147_s8 = scalar_lea.hbm %s807_s1, %s423_s5 }
  0x18   : > { %s140_s15 = scalar_lea.vmem [#allocation6], %s410_s4  ;;  %s149_s21 = sshll.u32 %s147_s8, 4  ;;  %s150_s21 = int_to_ptr.hbm [resolvable:$true] %s149_s21 }
  0x19   : > { %s151_s16 = sshll.u32 %s140_s15, 4  ;;  %p438_p10 = pnand %p446_p3, %p70_p7  ;;  %s152_s16 = int_to_ptr.vmem [resolvable:$true] %s151_s16 }
  0x1a   : > { %s137_s18 = scalar_lea.sflag [#allocation3], %s136_s30  ;;  %160 = sbr.rel (%p708_p8) target bundleno = 121 (0x79), region = 28 }
  0x1b   : > { %440 = dma.hbm_to_vmem [thread:$0]  (!%p438_p10), %s150_s21, 128, %s152_s16, %s137_s18  }
  0x1f   : > { %600 = dma.done.wait (%p685_p1), [#allocation5], 16  }
  0x20   : > { %602 = vsyncadd (%p685_p1), [#allocation5], 4294967280  ;;  %s750_s22 = sand.u32 1, %s617_s10  }
  0x21   : > { %s415_s23 = sshll.u32 %s750_s22, 3  ;;  %s168_s26 = scalar_lea.sflag [#allocation3], %s750_s22 }
  0x22   : > { %s171_s27 = scalar_lea.vmem [#allocation6], %s415_s23 }
  0x23   : > { %604 = dma.done.wait (%p695_p4), %s168_s26, 128  }
  0x24   : > { %606 = vsyncadd (%p695_p4), %s168_s26, 4294967168 }
  0x25   : > { %177 = sfence }
  0x26   : > { %v196_v0 = vld [vmem:[%s171_s27] sm:$0xff]  ;;  %vm205_vm0 = vcmask 1043456   ;;  %s197_s17 = sld [smem:[#allocation2]]  ;;  %s424_s24 = sshll.u32 %s625_s12, 3 }
  0x27   : > { %200 = vst [vmem:[#allocation1] ss:$2 sm:$0xff] %v196_v0  ;;  %s417_s19 = sld [smem:[#allocation2 + $0x1]]  ;;  %s304_s4 = scalar_lea.hbm %s808_s2, %s424_s24 }
  0x28   : > { %s193_s5 = scalar_lea.vmem [#allocation7], %s415_s23  ;;  %s308_s12 = sshll.u32 %s304_s4, 4  ;;  %s309_s12 = int_to_ptr.hbm [resolvable:$true] %s308_s12 }
  0x29   : > { %s306_s6 = sshll.u32 %s193_s5, 4  ;;  %s291_s7 = scalar_lea.sflag [#allocation4], %s750_s22  ;;  %s307_s6 = int_to_ptr.vmem [resolvable:$true] %s306_s6 }
  0x2a   : > { %s561_s8 = sshra.s32 %s309_s12, 4  ;;  %s567_s18 = scalar_lea.hbm %s808_s2, 16  ;;  %s562_s8 = int_to_ptr.hbm [resolvable:$true] %s561_s8 }
  0x2b   : > { %s563_s15 = scalar_lea.hbm %s562_s8, 8  ;;  %p568_p8 = scmp.lt.s32.totalorder %s562_s8, %s808_s2 }
  0x2c   : > { %v274_v23 = vstv %s197_s17  ;;  %p564_p1 = scmp.ne.s32.totalorder %s562_s8, %s563_s15  ;;  %p569_p11 = scmp.lt.s32.totalorder %s567_s18, %s563_s15 }
  0x2d   : > { %v271_v55 = vstv %s417_s19 }
  0x2e   : > { %v201_v1 = vld.sshfl [vmem:[#allocation1] sm:$0xff pattern:$0x75316420]  ;;  %v202_v2 = vld.sshfl [vmem:[#allocation1 + $0x8] sm:$0xff pattern:$0x75316420]  ;;  %p565_p2 = pnand %p564_p1, %p729_p9  ;;  %p570_p12 = por %p569_p11, %p568_p8 }
  0x2f   : > { %v206_v3 = vsel %vm205_vm0, %v201_v1, 0.0  ;;  %v213_v4 = vsel %vm205_vm0, %v202_v2, 0.0 }
  0x30   : > { %v207_v5 = vrot.slane %v206_v3, 4  ;;  %v214_v6 = vrot.slane %v213_v4, 4  ;;  %p566_p4 = pneg %p565_p2 }
  0x32   : > { %v208_v7 = vadd.f32 %v207_v5, %v206_v3  ;;  %v215_v8 = vadd.f32 %v214_v6, %v213_v4  ;;  %p571_p13 = pnand %p570_p12, %p566_p4 }
  0x34   : > { %v209_v9 = vrot.slane %v208_v7, 2  ;;  %v216_v10 = vrot.slane %v215_v8, 2 }
  0x36   : > { %v210_v11 = vadd.f32 %v209_v9, %v208_v7  ;;  %v217_v12 = vadd.f32 %v216_v10, %v215_v8 }
  0x38   : > { %v211_v13 = vrot.slane %v210_v11, 1  ;;  %v218_v14 = vrot.slane %v217_v12, 1 }
  0x3a   : > { %v212_v15 = vadd.f32 %v211_v13, %v210_v11  ;;  %v219_v16 = vadd.f32 %v218_v14, %v217_v12 }
  0x3c   : > { %v221_v17 = vmul.f32 0.25, %v219_v16  ;;  %v220_v18 = vmul.f32 0.25, %v212_v15 }
  0x3e   : > { %v224_v19 = vrot.slane %v221_v17, 4 }
  0x40   : > { %v225_v20 = vsel %vm205_vm0, %v220_v18, %v224_v19 }
  0x41   : > { %v227_v21 = vsub.f32 %v196_v0, %v225_v20 }
  0x43   : > { %v228_v22 = vmul.f32 %v227_v21, %v227_v21  ;;  %v275_v24 = vadd.f32 %v274_v23, %v227_v21 }
  0x45   : > { %230 = vst [vmem:[#allocation1] ss:$2 sm:$0xff] %v228_v22 }
  0x4c   : > { %v231_v25 = vld.sshfl [vmem:[#allocation1] sm:$0xff pattern:$0x75316420]  ;;  %v232_v26 = vld.sshfl [vmem:[#allocation1 + $0x8] sm:$0xff pattern:$0x75316420] }
  0x4d   : > { %v235_v27 = vsel %vm205_vm0, %v231_v25, 0.0  ;;  %v242_v28 = vsel %vm205_vm0, %v232_v26, 0.0  ;;  %277 = vst [vmem:[#allocation1] ss:$2 sm:$0xff] %v275_v24 }
  0x4e   : > { %v236_v29 = vrot.slane %v235_v27, 4  ;;  %v243_v30 = vrot.slane %v242_v28, 4 }
  0x50   : > { %v237_v31 = vadd.f32 %v236_v29, %v235_v27  ;;  %v244_v32 = vadd.f32 %v243_v30, %v242_v28 }
  0x52   : > { %v238_v33 = vrot.slane %v237_v31, 2  ;;  %v245_v34 = vrot.slane %v244_v32, 2 }
  0x54   : > { %v239_v35 = vadd.f32 %v238_v33, %v237_v31  ;;  %v246_v36 = vadd.f32 %v245_v34, %v244_v32  ;;  %v279_v60 = vld.sshfl [vmem:[#allocation1 + $0x8] sm:$0xff pattern:$0x75316420]  ;;  %v278_v62 = vld.sshfl [vmem:[#allocation1] sm:$0xff pattern:$0x75316420] }
  0x56   : > { %v240_v37 = vrot.slane %v239_v35, 1  ;;  %v247_v38 = vrot.slane %v246_v36, 1 }
  0x58   : > { %v241_v39 = vadd.f32 %v240_v37, %v239_v35  ;;  %v248_v40 = vadd.f32 %v247_v38, %v246_v36 }
  0x5a   : > { %v249_v41 = vmul.f32 0.25, %v241_v39  ;;  %v250_v42 = vmul.f32 0.25, %v248_v40 }
  0x5c   : > { %498 = vrsqrt.f32 %v249_v41  ;;  %vm257_vm3 = vweird.f32 %v249_v41  ;;  %vm267_vm5 = vweird.f32 %v250_v42 }
  0x5d   : > { %500 = vrsqrt.f32 %v250_v42 }
  0x62   : > { %v499_v43 = vpop.eup %498 }
  0x63   : > { %v501_v44 = vpop.eup %500  ;;  %v252_v45 = vmul.f32 %v499_v43, %v249_v41  ;;  %vm258_vm1 = vweird.f32 %v499_v43 }
  0x64   : > { %v262_v46 = vmul.f32 %v501_v44, %v250_v42  ;;  %vm268_vm2 = vweird.f32 %v501_v44  ;;  %vm259_vm4 = vmor %vm257_vm3, %vm258_vm1 }
  0x65   : > { %v253_v47 = vmul.f32 %v499_v43, %v252_v45  ;;  %vm269_vm6 = vmor %vm267_vm5, %vm268_vm2 }
  0x66   : > { %v263_v48 = vmul.f32 %v501_v44, %v262_v46 }
  0x67   : > { %v254_v49 = vmul.f32 0.5, %v253_v47 }
  0x68   : > { %v264_v50 = vmul.f32 0.5, %v263_v48 }
  0x69   : > { %v255_v51 = vsub.f32 1.5, %v254_v49 }
  0x6a   : > { %v265_v52 = vsub.f32 1.5, %v264_v50 }
  0x6b   : > { %v256_v53 = vmul.f32 %v499_v43, %v255_v51 }
  0x6c   : > { %v266_v54 = vmul.f32 %v501_v44, %v265_v52 }
  0x6d   : > { %v260_v56 = vsel %vm259_vm4, %v499_v43, %v256_v53 }
  0x6e   : > { %v270_v57 = vsel %vm269_vm6, %v501_v44, %v266_v54  ;;  %v272_v58 = vmul.f32 %v271_v55, %v260_v56 }
  0x6f   : > { %v273_v59 = vmul.f32 %v271_v55, %v270_v57 }
  0x70   : > { %v282_v63 = vmul.f32 %v278_v62, %v272_v58 }
  0x71   : > { %v283_v61 = vmul.f32 %v279_v60, %v273_v59 }
  0x73   : > { %v286_v0 = vrot.slane %v283_v61, 4 }
  0x75   : > { %v287_v1 = vsel %vm205_vm0, %v282_v63, %v286_v0 }
  0x76   : > { %289 = vst [vmem:[%s193_s5] sm:$0xff] %v287_v1 }
  0x77   : > { %574 = shalt.err (!%p571_p13)
}
  0x78   : > { %431 = dma.vmem_to_hbm [thread:$0]  (%p729_p9), %s307_s6, 128, %s309_s12, %s291_s7  }
  0x79 PF: > { %s320_s22 = sand.u32 1, %s613_s9   ;;  %p815_p0 = scmp.ge.s32.totalorder %s633_s14, 2 }
  0x7a   : > { %s321_s27 = scalar_lea.sflag [#allocation4], %s320_s22 }
  0x7b   : > { %p442_p3 = pnand %p815_p0, %p700_p6 }
  0x7d   : > { %p443_p5 = pneg %p442_p3 }
  0x7f   : > { %608 = dma.done.wait (%p443_p5), %s321_s27, 128  }
  0x80   : > { %610 = vsyncadd (%p443_p5), %s321_s27, 4294967168  ;;  %s19_s14 = sadd.s32 1, %s633_s14   ;;  %s816_s9 = smov %s617_s10 }
  0x81   : > { %p16_p7 = scmp.ge.s32.totalorder %s19_s14, 4   ;;  %s817_s10 = smov %s621_s11 }
  0x82   : > { %s818_s11 = smov %s735_s3  ;;  %s819_s12 = smov %s629_s13 }
  0x83   : > { %s820_s13 = smov %s822_s25  ;;  %18 = sbr.rel (!%p16_p7) target bundleno = 7 (0x7), region = 78 }
  0x88   :  { %327 = vsyncpa [#allocation3], 1 }
  0x89   :  { %329 = vsyncpa [#allocation3 + $0x1], 1 }
  0x8a   :  { %330 = vsyncpa [#allocation4], 1 }
  0x8b   :  { %332 = vsyncpa [#allocation4 + $0x1], 1 }
  0x8c   :  { %333 = vsyncpa [#allocation5], 1 }
  0x8d   :  { %335 = vsyncpa [#allocation5 + $0x1], 1 }

</bundles_post_ra>
